<compile_context>
chip_gen: v6e
topology: v6e:2x2x1
jax: 0.10.0
libtpu: 0.0.40
codegen_flags: <defaults>
</compile_context>

<pallas_src>
import jax
import jax.numpy as jnp
import numpy as np
from jax.experimental import pallas as pl
from jax.experimental.pallas import tpu as pltpu


# ----------------------------------------------------------------------------
# Host-side weight prep: fold a 3x3 conv's W axis into banded matmul weights.
# ----------------------------------------------------------------------------
def _band_weights(w_hwio, w_img):
    """(3, 3, C, O) HWIO weights -> (3, W*C, W*O) banded matrices.

    The 3x3 window is clipped at the image edge inside the band matrix, so
    K = W*C (lane-tile aligned) and the kernel needs no horizontal padding:

      M[dh, wp*C + c, w*O + o] = w_hwio[dh, wp - w + 1, c, o]
                                 if 0 <= wp - w + 1 < 3 else 0

    so  out_row(h) = sum_dh  x_row(h + dh - 1) @ M[dh]
    computes a full 3x3 "same" convolution of one image row with a lane-dense
    (W * O)-wide output.  Rows h-1 / h+1 outside the image are supplied as
    zero halo rows by the kernel's VMEM scratch.
    """
    kh, kw, c, o = w_hwio.shape
    wp = jnp.arange(w_img)
    wo = jnp.arange(w_img)
    dw = jnp.arange(kw)
    mask = (wp[None, :, None] == (wo[None, None, :] + dw[:, None, None] - 1))
    mask = mask.astype(jnp.float32)                      # (kw, W, W)
    m = jnp.einsum('dpw,hdco->hpcwo', mask, w_hwio.astype(jnp.float32))
    return m.reshape(kh, w_img * c, w_img * o)


# ----------------------------------------------------------------------------
# Fused doubleConv (conv3x3+BN+ReLU twice) on the concatenated NHWC input.
# ----------------------------------------------------------------------------
def double_conv_fused(x_nhwc, p, eps=1e-5):
    N, H, W, Cin = x_nhwc.shape
    Cmid = p['w1'].shape[-1]
    Cout = p['w2'].shape[-1]
    Kin, Kmid, Kout = W * Cin, W * Cmid, W * Cout
    M = N * H                                       # batch folded into M

    # Fold eval-mode BN (+ conv bias) into per-channel scale/shift and tile
    # them so they broadcast over the lane-dense (W*C) rows.
    s1 = p['g1'] / jnp.sqrt(p['v1'] + eps)
    t1 = (p['b1'] - p['m1']) * s1 + p['be1']
    s2 = p['g2'] / jnp.sqrt(p['v2'] + eps)
    t2 = (p['b2'] - p['m2']) * s2 + p['be2']
    s1t = jnp.tile(s1, W).reshape(1, Kmid).astype(jnp.float32)
    t1t = jnp.tile(t1, W).reshape(1, Kmid).astype(jnp.float32)
    s2t = jnp.tile(s2, W).reshape(1, Kout).astype(jnp.float32)
    t2t = jnp.tile(t2, W).reshape(1, Kout).astype(jnp.float32)

    m1 = _band_weights(p['w1'], W)                  # (3, Kin,  Kmid)
    m2 = _band_weights(p['w2'], W)                  # (3, Kmid, Kout)

    # Row-flattened view (free row-major reshape in HBM).
    xf = x_nhwc.reshape(N, H, Kin).astype(jnp.float32)

    def kernel(x_ref, m1_ref, s1_ref, t1_ref, m2_ref, s2_ref, t2_ref,
               o_ref, xp, hp):
        # Zero ONLY the halo rows (row 0 and row H+1 per image); the interior
        # is fully overwritten every invocation.
        zin = jnp.zeros((N, 1, Kin), jnp.float32)
        zmid = jnp.zeros((N, 1, Kmid), jnp.float32)
        xp[:, 0:1, :] = zin
        xp[:, H + 1:H + 2, :] = zin
        hp[:, 0:1, :] = zmid
        hp[:, H + 1:H + 2, :] = zmid

        # Lane-0, lane-dense interior write (unmasked vst).
        xp[:, 1:H + 1, :] = x_ref[...]

        # ---- conv1 (3x3, pad 1) + BN + ReLU ---------------------------------
        # 3 row-shifted matmuls; M = N*H rows, K = W*Cin = 128 lanes each.
        acc1 = jnp.zeros((M, Kmid), jnp.float32)
        for dh in range(3):
            lhs = xp[:, dh:dh + H, :].reshape(M, Kin)
            acc1 = acc1 + jnp.dot(lhs, m1_ref[dh],
                                  preferred_element_type=jnp.float32)
        h1 = jnp.maximum(acc1 * s1_ref[...] + t1_ref[...], 0.0)
        # Intermediate activation stays in VMEM — no HBM round trip.
        hp[:, 1:H + 1, :] = h1.reshape(N, H, Kmid)

        # ---- conv2 (3x3, pad 1) + BN + ReLU ---------------------------------
        acc2 = jnp.zeros((M, Kout), jnp.float32)
        for dh in range(3):
            lhs = hp[:, dh:dh + H, :].reshape(M, Kmid)
            acc2 = acc2 + jnp.dot(lhs, m2_ref[dh],
                                  preferred_element_type=jnp.float32)
        y = jnp.maximum(acc2 * s2_ref[...] + t2_ref[...], 0.0)
        o_ref[...] = y.astype(o_ref.dtype)          # (M, Kout) lane-dense store

    flops = 2 * M * 3 * (Kin * Kmid + Kmid * Kout)
    bytes_accessed = 4 * (xf.size + m1.size + m2.size
                          + s1t.size + t1t.size + s2t.size + t2t.size
                          + M * Kout)

    vmem_spec = pl.BlockSpec(memory_space=pltpu.MemorySpace.VMEM)
    out = pl.pallas_call(
        kernel,
        out_shape=jax.ShapeDtypeStruct((M, Kout), x_nhwc.dtype),
        in_specs=[vmem_spec] * 7,
        out_specs=vmem_spec,
        scratch_shapes=[
            pltpu.VMEM((N, H + 2, Kin), jnp.float32),    # padded input rows
            pltpu.VMEM((N, H + 2, Kmid), jnp.float32),   # padded conv1 output
        ],
        cost_estimate=pl.CostEstimate(flops=flops, transcendentals=0,
                                      bytes_accessed=bytes_accessed),
    )(xf, m1, s1t, t1t, m2, s2t, t2t)

    return out.reshape(N, H, W, Cout)


# ----------------------------------------------------------------------------
# JAX glue: bilinear x2 upsample (align_corners=True), pad, layout plumbing
# ----------------------------------------------------------------------------
def upsample_bilinear_x2_align_corners(x_nchw):
    N, C, H, W = x_nchw.shape
    Ho, Wo = 2 * H, 2 * W

    def coords(n_in, n_out):
        if n_out == 1:
            src = jnp.zeros((1,), jnp.float32)
        else:
            src = jnp.arange(n_out, dtype=jnp.float32) * (n_in - 1) / (n_out - 1)
        i0 = jnp.clip(jnp.floor(src).astype(jnp.int32), 0, n_in - 1)
        i1 = jnp.clip(i0 + 1, 0, n_in - 1)
        frac = src - i0.astype(jnp.float32)
        return i0, i1, frac

    y0, y1, fy = coords(H, Ho)
    x0, x1, fx = coords(W, Wo)
    r0 = x_nchw[:, :, y0, :]
    r1 = x_nchw[:, :, y1, :]
    rows = r0 * (1.0 - fy)[None, None, :, None] + r1 * fy[None, None, :, None]
    c0 = rows[:, :, :, x0]
    c1 = rows[:, :, :, x1]
    out = c0 * (1.0 - fx)[None, None, None, :] + c1 * fx[None, None, None, :]
    return out.astype(x_nchw.dtype)


def up_nets_forward(params, x1, x2):
    # x1, x2 are NCHW (PyTorch convention)
    x1u = upsample_bilinear_x2_align_corners(x1)
    diff_h = x2.shape[2] - x1u.shape[2]    # assumed >= 0 (U-Net case)
    diff_w = x2.shape[3] - x1u.shape[3]
    x1u = jnp.pad(x1u, ((0, 0), (0, 0),
                        (diff_h // 2, diff_h - diff_h // 2),
                        (diff_w // 2, diff_w - diff_w // 2)))
    # NCHW -> NHWC plus channel concat [x2, x1]: XLA fuses this into one copy,
    # so the kernel sees a single lane-dense (N, H, W*(C2+C1)) input.
    x_nhwc = jnp.concatenate([jnp.transpose(x2, (0, 2, 3, 1)),
                              jnp.transpose(x1u, (0, 2, 3, 1))], axis=-1)
    y = double_conv_fused(x_nhwc, params)            # fused Pallas kernel
    return jnp.transpose(y, (0, 3, 1, 2))            # back to NCHW


# ----------------------------------------------------------------------------
# Pure-JAX reference (for correctness check)
# ----------------------------------------------------------------------------
def _conv_bn_relu_ref(x_nhwc, w, b, g, be, m, v, eps=1e-5):
    y = jax.lax.conv_general_dilated(
        x_nhwc, w, (1, 1), 'SAME',
        dimension_numbers=('NHWC', 'HWIO', 'NHWC'))
    y = y + b
    y = g * (y - m) / jnp.sqrt(v + eps) + be
    return jnp.maximum(y, 0.0)


def up_nets_ref(params, x1, x2):
    x1u = upsample_bilinear_x2_align_corners(x1)
    x = jnp.concatenate([x2, x1u], axis=1)
    x_nhwc = jnp.transpose(x, (0, 2, 3, 1))
    h = _conv_bn_relu_ref(x_nhwc, params['w1'], params['b1'],
                          params['g1'], params['be1'], params['m1'], params['v1'])
    h = _conv_bn_relu_ref(h, params['w2'], params['b2'],
                          params['g2'], params['be2'], params['m2'], params['v2'])
    return jnp.transpose(h, (0, 3, 1, 2))


# ----------------------------------------------------------------------------
# Deterministic parameter init (doubleConv(input_channels, output_channels))
# ----------------------------------------------------------------------------
def init_params(key, cin, cout, dtype=jnp.float32):
    mild = cout
    k1, k2, k3, k4 = jax.random.split(key, 4)
    return {
        'w1': jax.random.normal(k1, (3, 3, cin, mild), dtype) * 0.1,   # HWIO
        'b1': jax.random.normal(k2, (mild,), dtype) * 0.1,
        'g1': jnp.linspace(0.5, 1.5, mild, dtype=dtype),
        'be1': jnp.linspace(-0.1, 0.1, mild, dtype=dtype),
        'm1': jnp.linspace(-0.05, 0.05, mild, dtype=dtype),
        'v1': jnp.linspace(0.8, 1.2, mild, dtype=dtype),
        'w2': jax.random.normal(k3, (3, 3, mild, cout), dtype) * 0.1,  # HWIO
        'b2': jax.random.normal(k4, (cout,), dtype) * 0.1,
        'g2': jnp.linspace(0.7, 1.3, cout, dtype=dtype),
        'be2': jnp.linspace(-0.2, 0.2, cout, dtype=dtype),
        'm2': jnp.linspace(-0.02, 0.02, cout, dtype=dtype),
        'v2': jnp.linspace(0.9, 1.1, cout, dtype=dtype),
    }


if __name__ == "__main__":
    key = jax.random.PRNGKey(0)
    kx1, kx2, kp = jax.random.split(key, 3)

    # upNets(input_channels=8, output_channels=8, bilinear=True)
    # x1: decoder feature (N, 4, 8, 8); x2: skip connection (N, 4, 16, 16)
    x1 = jax.random.normal(kx1, (2, 4, 8, 8), jnp.float32)
    x2 = jax.random.normal(kx2, (2, 4, 16, 16), jnp.float32)
    params = init_params(kp, cin=8, cout=8)

    out = up_nets_forward(params, x1, x2)
    out = jax.block_until_ready(out)
    assert out.shape == (2, 8, 16, 16), out.shape

    ref = jax.block_until_ready(up_nets_ref(params, x1, x2))
    np.testing.assert_allclose(np.asarray(out), np.asarray(ref),
                               rtol=1e-3, atol=1e-3)
    print("KERNEL_OK")
</pallas_src>

<mosaic_0001>
module attributes {stable_mosaic.version = 11 : i64} {
  func.func @kernel(%arg0: memref<2x16x128xf32, #tpu.memory_space<vmem>>, %arg1: memref<3x128x128xf32, #tpu.memory_space<vmem>>, %arg2: memref<1x128xf32, #tpu.memory_space<vmem>>, %arg3: memref<1x128xf32, #tpu.memory_space<vmem>>, %arg4: memref<3x128x128xf32, #tpu.memory_space<vmem>>, %arg5: memref<1x128xf32, #tpu.memory_space<vmem>>, %arg6: memref<1x128xf32, #tpu.memory_space<vmem>>, %arg7: memref<32x128xf32, #tpu.memory_space<vmem>>, %arg8: memref<2x18x128xf32, #tpu.memory_space<vmem>>, %arg9: memref<2x18x128xf32, #tpu.memory_space<vmem>>) attributes {dimension_semantics = [], scalar_prefetch = 0 : i64, scratch_operands = 2 : i64, tpu.core_type = #tpu.core_type<tc>} {
    %cst = arith.constant 0.000000e+00 : f32
    %0 = vector.broadcast %cst : f32 to vector<2x1x128xf32>
    %cst_0 = arith.constant 0.000000e+00 : f32
    %1 = vector.broadcast %cst_0 : f32 to vector<2x1x128xf32>
    %c0 = arith.constant 0 : index
    %c0_1 = arith.constant 0 : index
    %c0_2 = arith.constant 0 : index
    %2 = vector.load %arg8[%c0, %c0_1, %c0_2] : memref<2x18x128xf32, #tpu.memory_space<vmem>>, vector<2x1x128xf32>
    tpu.vector_store %arg8[%c0, %c0_1, %c0_2], %0 {strides = array<i32>} : memref<2x18x128xf32, #tpu.memory_space<vmem>>, vector<2x1x128xf32>,
    %c0_3 = arith.constant 0 : index
    %c17 = arith.constant 17 : index
    %c0_4 = arith.constant 0 : index
    %3 = vector.load %arg8[%c0_3, %c17, %c0_4] : memref<2x18x128xf32, #tpu.memory_space<vmem>>, vector<2x1x128xf32>
    tpu.vector_store %arg8[%c0_3, %c17, %c0_4], %0 {strides = array<i32>} : memref<2x18x128xf32, #tpu.memory_space<vmem>>, vector<2x1x128xf32>,
    %c0_5 = arith.constant 0 : index
    %c0_6 = arith.constant 0 : index
    %c0_7 = arith.constant 0 : index
    %4 = vector.load %arg9[%c0_5, %c0_6, %c0_7] : memref<2x18x128xf32, #tpu.memory_space<vmem>>, vector<2x1x128xf32>
    tpu.vector_store %arg9[%c0_5, %c0_6, %c0_7], %1 {strides = array<i32>} : memref<2x18x128xf32, #tpu.memory_space<vmem>>, vector<2x1x128xf32>,
    %c0_8 = arith.constant 0 : index
    %c17_9 = arith.constant 17 : index
    %c0_10 = arith.constant 0 : index
    %5 = vector.load %arg9[%c0_8, %c17_9, %c0_10] : memref<2x18x128xf32, #tpu.memory_space<vmem>>, vector<2x1x128xf32>
    tpu.vector_store %arg9[%c0_8, %c17_9, %c0_10], %1 {strides = array<i32>} : memref<2x18x128xf32, #tpu.memory_space<vmem>>, vector<2x1x128xf32>,
    %c0_11 = arith.constant 0 : index
    %c0_12 = arith.constant 0 : index
    %c0_13 = arith.constant 0 : index
    %6 = vector.load %arg0[%c0_11, %c0_12, %c0_13] : memref<2x16x128xf32, #tpu.memory_space<vmem>>, vector<2x16x128xf32>
    %c0_14 = arith.constant 0 : index
    %c1 = arith.constant 1 : index
    %c0_15 = arith.constant 0 : index
    %7 = vector.load %arg8[%c0_14, %c1, %c0_15] : memref<2x18x128xf32, #tpu.memory_space<vmem>>, vector<2x16x128xf32>
    tpu.vector_store %arg8[%c0_14, %c1, %c0_15], %6 {strides = array<i32>} : memref<2x18x128xf32, #tpu.memory_space<vmem>>, vector<2x16x128xf32>,
    %cst_16 = arith.constant 0.000000e+00 : f32
    %8 = vector.broadcast %cst_16 : f32 to vector<32x128xf32>
    %c0_17 = arith.constant 0 : index
    %c0_18 = arith.constant 0 : index
    %c0_19 = arith.constant 0 : index
    %9 = vector.load %arg8[%c0_17, %c0_18, %c0_19] : memref<2x18x128xf32, #tpu.memory_space<vmem>>, vector<2x16x128xf32>
    %10 = vector.shape_cast %9 : vector<2x16x128xf32> to vector<32x128xf32>
    %c0_20 = arith.constant 0 : index
    %c0_21 = arith.constant 0 : index
    %c0_22 = arith.constant 0 : index
    %11 = vector.load %arg1[%c0_20, %c0_21, %c0_22] : memref<3x128x128xf32, #tpu.memory_space<vmem>>, vector<1x128x128xf32>
    %12 = vector.shape_cast %11 : vector<1x128x128xf32> to vector<128x128xf32>
    %cst_23 = arith.constant dense<0.000000e+00> : vector<32x128xf32>
    %13 = tpu.matmul %10, %12, %cst_23 {dimension_numbers = #tpu.dot_dimension_numbers<[1], [0], [0], [1], [0, 0, 1, 1], [], []>} : vector<32x128xf32>, vector<128x128xf32>, vector<32x128xf32> -> vector<32x128xf32>
    %14 = arith.addf %8, %13 : vector<32x128xf32>
    %c0_24 = arith.constant 0 : index
    %c1_25 = arith.constant 1 : index
    %c0_26 = arith.constant 0 : index
    %15 = vector.load %arg8[%c0_24, %c1_25, %c0_26] : memref<2x18x128xf32, #tpu.memory_space<vmem>>, vector<2x16x128xf32>
    %16 = vector.shape_cast %15 : vector<2x16x128xf32> to vector<32x128xf32>
    %c1_27 = arith.constant 1 : index
    %c0_28 = arith.constant 0 : index
    %c0_29 = arith.constant 0 : index
    %17 = vector.load %arg1[%c1_27, %c0_28, %c0_29] : memref<3x128x128xf32, #tpu.memory_space<vmem>>, vector<1x128x128xf32>
    %18 = vector.shape_cast %17 : vector<1x128x128xf32> to vector<128x128xf32>
    %cst_30 = arith.constant dense<0.000000e+00> : vector<32x128xf32>
    %19 = tpu.matmul %16, %18, %cst_30 {dimension_numbers = #tpu.dot_dimension_numbers<[1], [0], [0], [1], [0, 0, 1, 1], [], []>} : vector<32x128xf32>, vector<128x128xf32>, vector<32x128xf32> -> vector<32x128xf32>
    %20 = arith.addf %14, %19 : vector<32x128xf32>
    %c0_31 = arith.constant 0 : index
    %c2 = arith.constant 2 : index
    %c0_32 = arith.constant 0 : index
    %21 = vector.load %arg8[%c0_31, %c2, %c0_32] : memref<2x18x128xf32, #tpu.memory_space<vmem>>, vector<2x16x128xf32>
    %22 = vector.shape_cast %21 : vector<2x16x128xf32> to vector<32x128xf32>
    %c2_33 = arith.constant 2 : index
    %c0_34 = arith.constant 0 : index
    %c0_35 = arith.constant 0 : index
    %23 = vector.load %arg1[%c2_33, %c0_34, %c0_35] : memref<3x128x128xf32, #tpu.memory_space<vmem>>, vector<1x128x128xf32>
    %24 = vector.shape_cast %23 : vector<1x128x128xf32> to vector<128x128xf32>
    %cst_36 = arith.constant dense<0.000000e+00> : vector<32x128xf32>
    %25 = tpu.matmul %22, %24, %cst_36 {dimension_numbers = #tpu.dot_dimension_numbers<[1], [0], [0], [1], [0, 0, 1, 1], [], []>} : vector<32x128xf32>, vector<128x128xf32>, vector<32x128xf32> -> vector<32x128xf32>
    %26 = arith.addf %20, %25 : vector<32x128xf32>
    %c0_37 = arith.constant 0 : index
    %c0_38 = arith.constant 0 : index
    %27 = vector.load %arg2[%c0_37, %c0_38] : memref<1x128xf32, #tpu.memory_space<vmem>>, vector<1x128xf32>
    %28 = vector.broadcast %27 : vector<1x128xf32> to vector<32x128xf32>
    %29 = arith.mulf %26, %28 : vector<32x128xf32>
    %c0_39 = arith.constant 0 : index
    %c0_40 = arith.constant 0 : index
    %30 = vector.load %arg3[%c0_39, %c0_40] : memref<1x128xf32, #tpu.memory_space<vmem>>, vector<1x128xf32>
    %31 = vector.broadcast %30 : vector<1x128xf32> to vector<32x128xf32>
    %32 = arith.addf %29, %31 : vector<32x128xf32>
    %cst_41 = arith.constant 0.000000e+00 : f32
    %33 = vector.broadcast %cst_41 : f32 to vector<32x128xf32>
    %34 = arith.maximumf %32, %33 : vector<32x128xf32>
    %35 = vector.shape_cast %34 : vector<32x128xf32> to vector<2x16x128xf32>
    %c0_42 = arith.constant 0 : index
    %c1_43 = arith.constant 1 : index
    %c0_44 = arith.constant 0 : index
    %36 = vector.load %arg9[%c0_42, %c1_43, %c0_44] : memref<2x18x128xf32, #tpu.memory_space<vmem>>, vector<2x16x128xf32>
    tpu.vector_store %arg9[%c0_42, %c1_43, %c0_44], %35 {strides = array<i32>} : memref<2x18x128xf32, #tpu.memory_space<vmem>>, vector<2x16x128xf32>,
    %cst_45 = arith.constant 0.000000e+00 : f32
    %37 = vector.broadcast %cst_45 : f32 to vector<32x128xf32>
    %c0_46 = arith.constant 0 : index
    %c0_47 = arith.constant 0 : index
    %c0_48 = arith.constant 0 : index
    %38 = vector.load %arg9[%c0_46, %c0_47, %c0_48] : memref<2x18x128xf32, #tpu.memory_space<vmem>>, vector<2x16x128xf32>
    %39 = vector.shape_cast %38 : vector<2x16x128xf32> to vector<32x128xf32>
    %c0_49 = arith.constant 0 : index
    %c0_50 = arith.constant 0 : index
    %c0_51 = arith.constant 0 : index
    %40 = vector.load %arg4[%c0_49, %c0_50, %c0_51] : memref<3x128x128xf32, #tpu.memory_space<vmem>>, vector<1x128x128xf32>
    %41 = vector.shape_cast %40 : vector<1x128x128xf32> to vector<128x128xf32>
    %cst_52 = arith.constant dense<0.000000e+00> : vector<32x128xf32>
    %42 = tpu.matmul %39, %41, %cst_52 {dimension_numbers = #tpu.dot_dimension_numbers<[1], [0], [0], [1], [0, 0, 1, 1], [], []>} : vector<32x128xf32>, vector<128x128xf32>, vector<32x128xf32> -> vector<32x128xf32>
    %43 = arith.addf %37, %42 : vector<32x128xf32>
    %c0_53 = arith.constant 0 : index
    %c1_54 = arith.constant 1 : index
    %c0_55 = arith.constant 0 : index
    %44 = vector.load %arg9[%c0_53, %c1_54, %c0_55] : memref<2x18x128xf32, #tpu.memory_space<vmem>>, vector<2x16x128xf32>
    %45 = vector.shape_cast %44 : vector<2x16x128xf32> to vector<32x128xf32>
    %c1_56 = arith.constant 1 : index
    %c0_57 = arith.constant 0 : index
    %c0_58 = arith.constant 0 : index
    %46 = vector.load %arg4[%c1_56, %c0_57, %c0_58] : memref<3x128x128xf32, #tpu.memory_space<vmem>>, vector<1x128x128xf32>
    %47 = vector.shape_cast %46 : vector<1x128x128xf32> to vector<128x128xf32>
    %cst_59 = arith.constant dense<0.000000e+00> : vector<32x128xf32>
    %48 = tpu.matmul %45, %47, %cst_59 {dimension_numbers = #tpu.dot_dimension_numbers<[1], [0], [0], [1], [0, 0, 1, 1], [], []>} : vector<32x128xf32>, vector<128x128xf32>, vector<32x128xf32> -> vector<32x128xf32>
    %49 = arith.addf %43, %48 : vector<32x128xf32>
    %c0_60 = arith.constant 0 : index
    %c2_61 = arith.constant 2 : index
    %c0_62 = arith.constant 0 : index
    %50 = vector.load %arg9[%c0_60, %c2_61, %c0_62] : memref<2x18x128xf32, #tpu.memory_space<vmem>>, vector<2x16x128xf32>
    %51 = vector.shape_cast %50 : vector<2x16x128xf32> to vector<32x128xf32>
    %c2_63 = arith.constant 2 : index
    %c0_64 = arith.constant 0 : index
    %c0_65 = arith.constant 0 : index
    %52 = vector.load %arg4[%c2_63, %c0_64, %c0_65] : memref<3x128x128xf32, #tpu.memory_space<vmem>>, vector<1x128x128xf32>
    %53 = vector.shape_cast %52 : vector<1x128x128xf32> to vector<128x128xf32>
    %cst_66 = arith.constant dense<0.000000e+00> : vector<32x128xf32>
    %54 = tpu.matmul %51, %53, %cst_66 {dimension_numbers = #tpu.dot_dimension_numbers<[1], [0], [0], [1], [0, 0, 1, 1], [], []>} : vector<32x128xf32>, vector<128x128xf32>, vector<32x128xf32> -> vector<32x128xf32>
    %55 = arith.addf %49, %54 : vector<32x128xf32>
    %c0_67 = arith.constant 0 : index
    %c0_68 = arith.constant 0 : index
    %56 = vector.load %arg5[%c0_67, %c0_68] : memref<1x128xf32, #tpu.memory_space<vmem>>, vector<1x128xf32>
    %57 = vector.broadcast %56 : vector<1x128xf32> to vector<32x128xf32>
    %58 = arith.mulf %55, %57 : vector<32x128xf32>
    %c0_69 = arith.constant 0 : index
    %c0_70 = arith.constant 0 : index
    %59 = vector.load %arg6[%c0_69, %c0_70] : memref<1x128xf32, #tpu.memory_space<vmem>>, vector<1x128xf32>
    %60 = vector.broadcast %59 : vector<1x128xf32> to vector<32x128xf32>
    %61 = arith.addf %58, %60 : vector<32x128xf32>
    %cst_71 = arith.constant 0.000000e+00 : f32
    %62 = vector.broadcast %cst_71 : f32 to vector<32x128xf32>
    %63 = arith.maximumf %61, %62 : vector<32x128xf32>
    %c0_72 = arith.constant 0 : index
    %c0_73 = arith.constant 0 : index
    %64 = vector.load %arg7[%c0_72, %c0_73] : memref<32x128xf32, #tpu.memory_space<vmem>>, vector<32x128xf32>
    tpu.vector_store %arg7[%c0_72, %c0_73], %63 {strides = array<i32>} : memref<32x128xf32, #tpu.memory_space<vmem>>, vector<32x128xf32>,
    return
  }
}

</mosaic_0001>

<bundles_post_ra>
// kernel: tpu_custom_call.1
= control target key start
LH: loop header
LB: loop body
LE: loop exit
PB: predicated region body
PF: predicated region fallthrough
CT: control target
= control target key end

     0   :  { %12 = vsyncpa [#allocation5], 0  ;;  %s1344_s0 = inlined_call_operand.hbm [shape: f32[2,16,128], index: 0, kind: input, shape index: {}]   ;;  %s1345_s1 = inlined_call_operand.hbm [shape: f32[3,128,128], index: 1, kind: input, shape index: {}]   ;;  %s1346_s2 = inlined_call_operand.vmem [shape: f32[1,128], index: 2, kind: input, shape index: {}]   ;;  %s1347_s3 = inlined_call_operand.vmem [shape: f32[1,128], index: 3, kind: input, shape index: {}]   ;;  %s1348_s4 = inlined_call_operand.hbm [shape: f32[3,128,128], index: 4, kind: input, shape index: {}]   ;;  %s1349_s5 = inlined_call_operand.vmem [shape: f32[1,128], index: 5, kind: input, shape index: {}]   ;;  %s1350_s6 = inlined_call_operand.vmem [shape: f32[1,128], index: 6, kind: input, shape index: {}]   ;;  %s1351_s7 = inlined_call_operand.hbm [shape: f32[32,128], index: 7, kind: output, shape index: {}]  }
   0x1   :  { %13 = vsyncpa [#allocation8], 0 }
   0x2   :  { %14 = vsyncpa [#allocation6], 0  ;;  %s1249_s24 = smov [#allocation7]   ;;  %s1250_s26 = smov [#allocation4]  }
   0x3   :  { %s32_s25 = sshll.u32 %s1249_s24, 4  ;;  %s20_s27 = sshll.u32 %s1250_s26, 4  ;;  %s33_s25 = int_to_ptr.vmem [resolvable:$true] %s32_s25  ;;  %s21_s27 = int_to_ptr.vmem [resolvable:$true] %s20_s27 }
   0x4   :  { %s1171_s28 = scalar_lea.vmem %s33_s25, 6144  ;;  %p1176_p1 = scmp.lt.s32.totalorder %s33_s25, %s33_s25 }
   0x5   :  { %p1172_p0 = scmp.ne.s32.totalorder %s33_s25, %s1171_s28  ;;  %p1177_p2 = scmp.lt.s32.totalorder %s1171_s28, %s1171_s28 }
   0x7   :  { %p1178_p3 = por %p1177_p2, %p1176_p1 }
   0x9   :  { %p1179_p4 = pnand %p1178_p3, %p1172_p0 }
   0xb   :  { %1182 = shalt.err (!%p1179_p4)
}
   0xc   :  { %s1251_s29 = smov 128   ;;  %s1252_s30 = smov 8  }
   0xd   :  { %38 = dma.hbm_to_vmem [thread:$0]  %s1345_s1, 6144, %s33_s25, [#allocation8], %s1251_s29, %s1251_s29, %s1252_s30  }
   0xe   :  { %s1191_s10 = scalar_lea.vmem %s21_s27, 512  ;;  %p1196_p6 = scmp.lt.s32.totalorder %s21_s27, %s21_s27 }
   0xf   :  { %p1192_p5 = scmp.ne.s32.totalorder %s21_s27, %s1191_s10  ;;  %p1197_p7 = scmp.lt.s32.totalorder %s1191_s10, %s1191_s10 }
  0x11   :  { %p1198_p8 = por %p1197_p7, %p1196_p6 }
  0x13   :  { %p1199_p9 = pnand %p1198_p8, %p1192_p5 }
  0x15   :  { %1202 = shalt.err (!%p1199_p9)
}
  0x16   :  { %26 = dma.hbm_to_vmem [thread:$0]  %s1344_s0, 512, %s21_s27, [#allocation5], %s1251_s29, %s1251_s29, %s1252_s30  }
  0x17   :  { %s1253_s13 = smov [#allocation9]  }
  0x18   :  { %s48_s14 = sshll.u32 %s1253_s13, 4  ;;  %s49_s14 = int_to_ptr.vmem [resolvable:$true] %s48_s14 }
  0x19   :  { %s1211_s15 = scalar_lea.vmem %s49_s14, 6144  ;;  %p1216_p11 = scmp.lt.s32.totalorder %s49_s14, %s49_s14 }
  0x1a   :  { %p1212_p10 = scmp.ne.s32.totalorder %s49_s14, %s1211_s15  ;;  %p1217_p12 = scmp.lt.s32.totalorder %s1211_s15, %s1211_s15 }
  0x1c   :  { %p1218_p13 = por %p1217_p12, %p1216_p11 }
  0x1e   :  { %p1219_p0 = pnand %p1218_p13, %p1212_p10 }
  0x20   :  { %1222 = shalt.err (!%p1219_p0)
}
  0x21   :  { %54 = dma.hbm_to_vmem [thread:$0]  %s1348_s4, 6144, %s49_s14, [#allocation8], %s1251_s29, %s1251_s29, %s1252_s30  }
  0x22   :  { %1243 = dma.done.wait [#allocation5], 512  }
  0x23   :  { %1244 = vsyncadd [#allocation5], 4294966784 }
  0x24   :  { %1245 = dma.done.wait [#allocation8], 12288  }
  0x25   :  { %1246 = vsyncadd [#allocation8], 4294955008  ;;  %v1254_v0 = vmov 0.0   ;;  %v124_v1 = vld [vmem:[#allocation7 + $0xf8] sm:$0xff]  ;;  %v123_v3 = vld [vmem:[#allocation7 + $0xf0] sm:$0xff] }
  0x26   :  { %68 = vst [vmem:[#allocation2] sm:$0x1] %v1254_v0  ;;  %69 = vst [vmem:[#allocation2 + $0x18] sm:$0x1] %v1254_v0  ;;  %v103_v2 = vld [vmem:[#allocation7 + $0x78] sm:$0xff]  ;;  %928 = vmatprep.subr.mxu0 %v124_v1  ;;  %v102_v4 = vld [vmem:[#allocation7 + $0x70] sm:$0xff] }
  0x27   :  { %70 = vst [vmem:[#allocation2 + $0x11] sm:$0x1] %v1254_v0  ;;  %71 = vst [vmem:[#allocation2 + $0x29] sm:$0x1] %v1254_v0  ;;  %966 = vmatprep.subr.mxu1 %v103_v2  ;;  %929 = vmatpush3.msra.mxu0 %v124_v1  ;;  %v122_v5 = vld [vmem:[#allocation7 + $0xe8] sm:$0xff]  ;;  %v121_v7 = vld [vmem:[#allocation7 + $0xe0] sm:$0xff] }
  0x28   :  { %72 = vst [vmem:[#allocation3] sm:$0x1] %v1254_v0  ;;  %73 = vst [vmem:[#allocation3 + $0x18] sm:$0x1] %v1254_v0  ;;  %967 = vmatpush3.msra.mxu1 %v103_v2  ;;  %v101_v6 = vld [vmem:[#allocation7 + $0x68] sm:$0xff]  ;;  %930 = vmatprep.subr.mxu0 %v123_v3  ;;  %v100_v8 = vld [vmem:[#allocation7 + $0x60] sm:$0xff] }
  0x29   :  { %74 = vst [vmem:[#allocation3 + $0x11] sm:$0x1] %v1254_v0  ;;  %75 = vst [vmem:[#allocation3 + $0x29] sm:$0x1] %v1254_v0  ;;  %968 = vmatprep.subr.mxu1 %v102_v4  ;;  %931 = vmatpush3.msra.mxu0 %v123_v3  ;;  %v120_v9 = vld [vmem:[#allocation7 + $0xd8] sm:$0xff]  ;;  %v119_v11 = vld [vmem:[#allocation7 + $0xd0] sm:$0xff] }
  0x2a   :  { %969 = vmatpush3.msra.mxu1 %v102_v4  ;;  %932 = vmatprep.subr.mxu0 %v122_v5  ;;  %v99_v10 = vld [vmem:[#allocation7 + $0x58] sm:$0xff]  ;;  %v98_v12 = vld [vmem:[#allocation7 + $0x50] sm:$0xff]  ;;  %v118_v13 = vld [vmem:[#allocation7 + $0xc8] sm:$0xff] }
  0x2b   :  { %970 = vmatprep.subr.mxu1 %v101_v6  ;;  %933 = vmatpush3.msra.mxu0 %v122_v5  ;;  %v97_v14 = vld [vmem:[#allocation7 + $0x48] sm:$0xff]  ;;  %v1314_v15 = vld [vmem:[#allocation4] sm:$0xff]  ;;  %v116_v19 = vld [vmem:[#allocation7 + $0xb8] sm:$0xff] }
  0x2c   :  { %971 = vmatpush3.msra.mxu1 %v101_v6  ;;  %934 = vmatprep.subr.mxu0 %v121_v7  ;;  %80 = vst [vmem:[#allocation2 + $0x1] sm:$0xff] %v1314_v15  ;;  %v1317_v16 = vld [vmem:[#allocation4 + $0x8] sm:$0xff]  ;;  %v117_v17 = vld [vmem:[#allocation7 + $0xc0] sm:$0xff]  ;;  %v95_v20 = vld [vmem:[#allocation7 + $0x38] sm:$0xff] }
  0x2d   :  { %972 = vmatprep.subr.mxu1 %v100_v8  ;;  %935 = vmatpush3.msra.mxu0 %v121_v7  ;;  %v96_v18 = vld [vmem:[#allocation7 + $0x40] sm:$0xff]  ;;  %81 = vst [vmem:[#allocation2 + $0x9] sm:$0xff] %v1317_v16  ;;  %v78_v21 = vld [vmem:[#allocation4 + $0x10] sm:$0xff]  ;;  %v1320_v24 = vld [vmem:[#allocation4 + $0x18] sm:$0xff] }
  0x2e   :  { %973 = vmatpush3.msra.mxu1 %v100_v8  ;;  %936 = vmatprep.subr.mxu0 %v120_v9  ;;  %v115_v22 = vld [vmem:[#allocation7 + $0xb0] sm:$0xff]  ;;  %82 = vst [vmem:[#allocation2 + $0x19] sm:$0xff] %v78_v21  ;;  %83 = vst [vmem:[#allocation2 + $0x21] sm:$0xff] %v1320_v24  ;;  %v114_v25 = vld [vmem:[#allocation7 + $0xa8] sm:$0xff] }
  0x2f   :  { %974 = vmatprep.subr.mxu1 %v99_v10  ;;  %937 = vmatpush3.msra.mxu0 %v120_v9  ;;  %v94_v23 = vld [vmem:[#allocation7 + $0x30] sm:$0xff]  ;;  %v93_v26 = vld [vmem:[#allocation7 + $0x28] sm:$0xff]  ;;  %v113_v27 = vld [vmem:[#allocation7 + $0xa0] sm:$0xff] }
  0x30   :  { %975 = vmatpush3.msra.mxu1 %v99_v10  ;;  %938 = vmatprep.subr.mxu0 %v119_v11  ;;  %v92_v28 = vld [vmem:[#allocation7 + $0x20] sm:$0xff]  ;;  %v112_v29 = vld [vmem:[#allocation7 + $0x98] sm:$0xff]  ;;  %v111_v31 = vld [vmem:[#allocation7 + $0x90] sm:$0xff] }
  0x31   :  { %976 = vmatprep.subr.mxu1 %v98_v12  ;;  %939 = vmatpush3.msra.mxu0 %v119_v11  ;;  %v91_v30 = vld [vmem:[#allocation7 + $0x18] sm:$0xff]  ;;  %v90_v32 = vld [vmem:[#allocation7 + $0x10] sm:$0xff]  ;;  %v110_v33 = vld [vmem:[#allocation7 + $0x88] sm:$0xff] }
  0x32   :  { %977 = vmatpush3.msra.mxu1 %v98_v12  ;;  %940 = vmatprep.subr.mxu0 %v118_v13  ;;  %v89_v34 = vld [vmem:[#allocation7 + $0x8] sm:$0xff]  ;;  %v109_v35 = vld [vmem:[#allocation7 + $0x80] sm:$0xff]  ;;  %v315_v39 = vld [vmem:[#allocation7 + $0x178] sm:$0xff] }
  0x33   :  { %978 = vmatprep.subr.mxu1 %v97_v14  ;;  %941 = vmatpush3.msra.mxu0 %v118_v13  ;;  %v88_v36 = vld [vmem:[#allocation7] sm:$0xff]  ;;  %v314_v41 = vld [vmem:[#allocation7 + $0x170] sm:$0xff]  ;;  %v313_v43 = vld [vmem:[#allocation7 + $0x168] sm:$0xff] }
  0x34   :  { %979 = vmatpush3.msra.mxu1 %v97_v14  ;;  %942 = vmatprep.subr.mxu0 %v117_v17  ;;  %v84_v37 = vld [vmem:[#allocation2] sm:$0xff]  ;;  %v85_v38 = vld [vmem:[#allocation2 + $0x8] sm:$0xff]  ;;  %v311_v46 = vld [vmem:[#allocation7 + $0x158] sm:$0xff] }
  0x35   :  { %980 = vmatprep.subr.mxu1 %v96_v18  ;;  %943 = vmatpush3.msra.mxu0 %v117_v17  ;;  %v86_v40 = vld [vmem:[#allocation2 + $0x18] sm:$0xff]  ;;  %v87_v42 = vld [vmem:[#allocation2 + $0x20] sm:$0xff]  ;;  %v310_v47 = vld [vmem:[#allocation7 + $0x150] sm:$0xff] }
  0x36   :  { %981 = vmatpush3.msra.mxu1 %v96_v18  ;;  %944 = vmatprep.subr.mxu0 %v116_v19  ;;  %v295_v44 = vld [vmem:[#allocation2 + $0x2] sm:$0xff]  ;;  %v307_v50 = vld [vmem:[#allocation7 + $0x138] sm:$0xff]  ;;  %v306_v51 = vld [vmem:[#allocation7 + $0x130] sm:$0xff] }
  0x37   :  { %982 = vmatprep.subr.mxu1 %v95_v20  ;;  %945 = vmatpush3.msra.mxu0 %v116_v19  ;;  %v312_v45 = vld [vmem:[#allocation7 + $0x160] sm:$0xff]  ;;  %v309_v48 = vld [vmem:[#allocation7 + $0x148] sm:$0xff]  ;;  %v303_v54 = vld [vmem:[#allocation7 + $0x118] sm:$0xff] }
  0x38   :  { %983 = vmatpush3.msra.mxu1 %v95_v20  ;;  %946 = vmatprep.subr.mxu0 %v115_v22  ;;  %v308_v49 = vld [vmem:[#allocation7 + $0x140] sm:$0xff]  ;;  %v305_v52 = vld [vmem:[#allocation7 + $0x128] sm:$0xff]  ;;  %v302_v55 = vld [vmem:[#allocation7 + $0x110] sm:$0xff] }
  0x39   :  { %984 = vmatprep.subr.mxu1 %v94_v23  ;;  %947 = vmatpush3.msra.mxu0 %v115_v22  ;;  %v304_v53 = vld [vmem:[#allocation7 + $0x120] sm:$0xff]  ;;  %v301_v56 = vld [vmem:[#allocation7 + $0x108] sm:$0xff]  ;;  %v475_v61 = vld [vmem:[#allocation9 + $0xf8] sm:$0xff] }
  0x3a   :  { %985 = vmatpush3.msra.mxu1 %v94_v23  ;;  %948 = vmatprep.subr.mxu0 %v114_v25  ;;  %v300_v57 = vld [vmem:[#allocation7 + $0x100] sm:$0xff]  ;;  %v296_v58 = vld [vmem:[#allocation2 + $0xa] sm:$0xff]  ;;  %v454_v62 = vld [vmem:[#allocation9 + $0x78] sm:$0xff] }
  0x3b   :  { %986 = vmatprep.subr.mxu1 %v93_v26  ;;  %949 = vmatpush3.msra.mxu0 %v114_v25  ;;  %v297_v59 = vld [vmem:[#allocation2 + $0x1a] sm:$0xff]  ;;  %v298_v60 = vld [vmem:[#allocation2 + $0x22] sm:$0xff]  ;;  %v474_v63 = vld [vmem:[#allocation9 + $0xf0] sm:$0xff] }
  0x3c   :  { %987 = vmatpush3.msra.mxu1 %v93_v26  ;;  %950 = vmatprep.subr.mxu0 %v113_v27  ;;  %v453_v0 = vld [vmem:[#allocation9 + $0x70] sm:$0xff]  ;;  %v473_v1 = vld [vmem:[#allocation9 + $0xe8] sm:$0xff]  ;;  %v472_v3 = vld [vmem:[#allocation9 + $0xe0] sm:$0xff] }
  0x3d   :  { %988 = vmatprep.subr.mxu1 %v92_v28  ;;  %951 = vmatpush3.msra.mxu0 %v113_v27  ;;  %v452_v2 = vld [vmem:[#allocation9 + $0x68] sm:$0xff]  ;;  %v451_v4 = vld [vmem:[#allocation9 + $0x60] sm:$0xff]  ;;  %v471_v5 = vld [vmem:[#allocation9 + $0xd8] sm:$0xff] }
  0x3e   :  { %989 = vmatpush3.msra.mxu1 %v92_v28  ;;  %952 = vmatprep.subr.mxu0 %v112_v29  ;;  %v450_v6 = vld [vmem:[#allocation9 + $0x58] sm:$0xff]  ;;  %v470_v7 = vld [vmem:[#allocation9 + $0xd0] sm:$0xff]  ;;  %v469_v9 = vld [vmem:[#allocation9 + $0xc8] sm:$0xff] }
  0x3f   :  { %990 = vmatprep.subr.mxu1 %v91_v30  ;;  %953 = vmatpush3.msra.mxu0 %v112_v29  ;;  %v449_v8 = vld [vmem:[#allocation9 + $0x50] sm:$0xff]  ;;  %v468_v10 = vld [vmem:[#allocation9 + $0xc0] sm:$0xff]  ;;  %v467_v11 = vld [vmem:[#allocation9 + $0xb8] sm:$0xff] }
  0x40   :  { %991 = vmatpush3.msra.mxu1 %v91_v30  ;;  %954 = vmatprep.subr.mxu0 %v111_v31  ;;  %v466_v12 = vld [vmem:[#allocation9 + $0xb0] sm:$0xff]  ;;  %v465_v13 = vld [vmem:[#allocation9 + $0xa8] sm:$0xff]  ;;  %v463_v17 = vld [vmem:[#allocation9 + $0x98] sm:$0xff] }
  0x41   :  { %992 = vmatprep.subr.mxu1 %v90_v32  ;;  %955 = vmatpush3.msra.mxu0 %v111_v31  ;;  %v448_v14 = vld [vmem:[#allocation9 + $0x48] sm:$0xff]  ;;  %v446_v18 = vld [vmem:[#allocation9 + $0x38] sm:$0xff]  ;;  %v462_v19 = vld [vmem:[#allocation9 + $0x90] sm:$0xff] }
  0x42   :  { %993 = vmatpush3.msra.mxu1 %v90_v32  ;;  %956 = vmatprep.subr.mxu0 %v110_v33  ;;  %v445_v20 = vld [vmem:[#allocation9 + $0x30] sm:$0xff]  ;;  %v444_v22 = vld [vmem:[#allocation9 + $0x28] sm:$0xff]  ;;  %v460_v23 = vld [vmem:[#allocation9 + $0x80] sm:$0xff] }
  0x43   :  { %994 = vmatprep.subr.mxu1 %v89_v34  ;;  %957 = vmatpush3.msra.mxu0 %v110_v33  ;;  %v666_v25 = vld [vmem:[#allocation9 + $0x178] sm:$0xff]  ;;  %v441_v27 = vld [vmem:[#allocation9 + $0x10] sm:$0xff]  ;;  %v440_v28 = vld [vmem:[#allocation9 + $0x8] sm:$0xff] }
  0x44   :  { %995 = vmatpush3.msra.mxu1 %v89_v34  ;;  %958 = vmatprep.subr.mxu0 %v109_v35  ;;  %v442_v26 = vld [vmem:[#allocation9 + $0x18] sm:$0xff]  ;;  %v439_v29 = vld [vmem:[#allocation9] sm:$0xff] }
  0x45   :  { %996 = vmatprep.subr.mxu1 %v88_v36  ;;  %959 = vmatpush3.msra.mxu0 %v109_v35 }
  0x46   :  { %960 = vmatprep.mubr.f32.mxu0 %v1314_v15  ;;  %997 = vmatpush3.msra.mxu1 %v88_v36  ;;  %v464_v15 = vld [vmem:[#allocation9 + $0xa0] sm:$0xff] }
  0x47   :  { %998 = vmatprep.mubr.f32.mxu1 %v84_v37  ;;  %961 = vmatmul.mubr.f32.vlgmr.msra.gmra.mxu0 %v1317_v16  ;;  %v447_v16 = vld [vmem:[#allocation9 + $0x40] sm:$0xff] }
  0x48   :  { %999 = vmatmul.mubr.f32.vlgmr.msra.gmra.mxu1 %v85_v38  ;;  %1004 = vmatprep.subr.mxu0 %v315_v39 }
  0x49   :  { %963 = vmatprep.mubr.f32.mxu0 %v78_v21  ;;  %1005 = vmatpush3.msra.mxu0 %v315_v39  ;;  %v461_v21 = vld [vmem:[#allocation9 + $0x88] sm:$0xff]  ;;  %v804_v39 = vld [vmem:[%s1346_s2] ss:$0 sm:$0xff] }
  0x4a   :  { %1001 = vmatprep.mubr.f32.mxu1 %v86_v40  ;;  %1006 = vmatprep.subr.mxu0 %v314_v41 }
  0x4b   :  { %1007 = vmatpush3.msra.mxu0 %v314_v41  ;;  %1042 = vmatprep.subr.mxu1 %v475_v61 }
  0x4c   :  { %1002 = vmatmul.mubr.f32.gmra.mxu1 %v87_v42  ;;  %1008 = vmatprep.subr.mxu0 %v313_v43 }
  0x4d   :  { %964 = vmatmul.mubr.f32.gmra.mxu0 %v1320_v24  ;;  %1043 = vmatpush3.msra.mxu1 %v475_v61  ;;  %v443_v24 = vld [vmem:[#allocation9 + $0x20] sm:$0xff] }
  0x4e   :  { %1009 = vmatpush3.msra.mxu0 %v313_v43  ;;  %1036 = vmatprep.mubr.f32.mxu0 %v295_v44  ;;  %v805_v43 = vld [vmem:[%s1347_s3] ss:$0 sm:$0xff] }
  0x4f   :  { %1010 = vmatprep.subr.mxu0 %v312_v45  ;;  %1044 = vmatprep.subr.mxu1 %v474_v63 }
  0x50   :  { %1011 = vmatpush3.msra.mxu0 %v312_v45  ;;  %1045 = vmatpush3.msra.mxu1 %v474_v63  ;;  %v665_v63 = vld [vmem:[#allocation9 + $0x170] sm:$0xff] }
  0x51   :  { %1012 = vmatprep.subr.mxu0 %v311_v46  ;;  %1046 = vmatprep.subr.mxu1 %v473_v1 }
  0x52   :  { %1013 = vmatpush3.msra.mxu0 %v311_v46  ;;  %1047 = vmatpush3.msra.mxu1 %v473_v1  ;;  %v664_v1 = vld [vmem:[#allocation9 + $0x168] sm:$0xff] }
  0x53   :  { %1014 = vmatprep.subr.mxu0 %v310_v47  ;;  %1048 = vmatprep.subr.mxu1 %v472_v3 }
  0x54   :  { %1015 = vmatpush3.msra.mxu0 %v310_v47  ;;  %1049 = vmatpush3.msra.mxu1 %v472_v3  ;;  %v662_v3 = vld [vmem:[#allocation9 + $0x158] sm:$0xff] }
  0x55   :  { %1016 = vmatprep.subr.mxu0 %v309_v48  ;;  %1050 = vmatprep.subr.mxu1 %v471_v5 }
  0x56   :  { %1017 = vmatpush3.msra.mxu0 %v309_v48  ;;  %1051 = vmatpush3.msra.mxu1 %v471_v5 }
  0x57   :  { %1018 = vmatprep.subr.mxu0 %v308_v49  ;;  %1052 = vmatprep.subr.mxu1 %v470_v7 }
  0x58   :  { %1019 = vmatpush3.msra.mxu0 %v308_v49  ;;  %1053 = vmatpush3.msra.mxu1 %v470_v7  ;;  %v661_v7 = vld [vmem:[#allocation9 + $0x150] sm:$0xff] }
  0x59   :  { %1020 = vmatprep.subr.mxu0 %v307_v50  ;;  %1054 = vmatprep.subr.mxu1 %v469_v9 }
  0x5a   :  { %1021 = vmatpush3.msra.mxu0 %v307_v50  ;;  %1055 = vmatpush3.msra.mxu1 %v469_v9 }
  0x5b   :  { %1022 = vmatprep.subr.mxu0 %v306_v51  ;;  %1056 = vmatprep.subr.mxu1 %v468_v10 }
  0x5c   :  { %1023 = vmatpush3.msra.mxu0 %v306_v51  ;;  %1057 = vmatpush3.msra.mxu1 %v468_v10  ;;  %v660_v10 = vld [vmem:[#allocation9 + $0x148] sm:$0xff] }
  0x5d   :  { %1024 = vmatprep.subr.mxu0 %v305_v52  ;;  %1058 = vmatprep.subr.mxu1 %v467_v11 }
  0x5e   :  { %1025 = vmatpush3.msra.mxu0 %v305_v52  ;;  %1059 = vmatpush3.msra.mxu1 %v467_v11  ;;  %v659_v11 = vld [vmem:[#allocation9 + $0x140] sm:$0xff] }
  0x5f   :  { %1026 = vmatprep.subr.mxu0 %v304_v53  ;;  %1060 = vmatprep.subr.mxu1 %v466_v12 }
  0x60   :  { %1027 = vmatpush3.msra.mxu0 %v304_v53  ;;  %1061 = vmatpush3.msra.mxu1 %v466_v12  ;;  %v658_v12 = vld [vmem:[#allocation9 + $0x138] sm:$0xff] }
  0x61   :  { %1028 = vmatprep.subr.mxu0 %v303_v54  ;;  %1062 = vmatprep.subr.mxu1 %v465_v13 }
  0x62   :  { %1029 = vmatpush3.msra.mxu0 %v303_v54  ;;  %1063 = vmatpush3.msra.mxu1 %v465_v13  ;;  %v657_v13 = vld [vmem:[#allocation9 + $0x130] sm:$0xff] }
  0x63   :  { %1030 = vmatprep.subr.mxu0 %v302_v55  ;;  %1064 = vmatprep.subr.mxu1 %v464_v15 }
  0x64   :  { %1031 = vmatpush3.msra.mxu0 %v302_v55  ;;  %1065 = vmatpush3.msra.mxu1 %v464_v15  ;;  %v655_v15 = vld [vmem:[#allocation9 + $0x120] sm:$0xff] }
  0x65   :  { %1032 = vmatprep.subr.mxu0 %v301_v56  ;;  %1066 = vmatprep.subr.mxu1 %v463_v17 }
  0x66   :  { %1033 = vmatpush3.msra.mxu0 %v301_v56  ;;  %1067 = vmatpush3.msra.mxu1 %v463_v17  ;;  %v653_v17 = vld [vmem:[#allocation9 + $0x110] sm:$0xff] }
  0x67   :  { %1034 = vmatprep.subr.mxu0 %v300_v57  ;;  %1068 = vmatprep.subr.mxu1 %v462_v19 }
  0x68   :  { %1035 = vmatpush3.msra.mxu0 %v300_v57  ;;  %1069 = vmatpush3.msra.mxu1 %v462_v19  ;;  %v651_v19 = vld [vmem:[#allocation9 + $0x100] sm:$0xff] }
  0x69   :  { %1037 = vmatmul.mubr.f32.vlgmr.msra.gmra.mxu0 %v296_v58  ;;  %1080 = vmatprep.subr.mxu0 %v454_v62 }
  0x6a   :  { %1039 = vmatprep.mubr.f32.mxu0 %v297_v59  ;;  %1081 = vmatpush3.msra.mxu0 %v454_v62 }
  0x6b   :  { %1082 = vmatprep.subr.mxu0 %v453_v0  ;;  %1070 = vmatprep.subr.mxu1 %v461_v21 }
  0x6c   :  { %1083 = vmatpush3.msra.mxu0 %v453_v0  ;;  %1071 = vmatpush3.msra.mxu1 %v461_v21 }
  0x6d   :  { %1040 = vmatmul.mubr.f32.gmra.mxu0 %v298_v60  ;;  %1084 = vmatprep.subr.mxu0 %v452_v2 }
  0x6e   :  { %1085 = vmatpush3.msra.mxu0 %v452_v2  ;;  %1072 = vmatprep.subr.mxu1 %v460_v23  ;;  %v663_v2 = vld [vmem:[#allocation9 + $0x160] sm:$0xff] }
  0x6f   :  { %1086 = vmatprep.subr.mxu0 %v451_v4  ;;  %1073 = vmatpush3.msra.mxu1 %v460_v23 }
  0x70   :  { %1087 = vmatpush3.msra.mxu0 %v451_v4  ;;  %1118 = vmatprep.subr.mxu1 %v666_v25 }
  0x71   :  { %1088 = vmatprep.subr.mxu0 %v450_v6 }
  0x72   :  { %1089 = vmatpush3.msra.mxu0 %v450_v6 }
  0x73   :  { %1090 = vmatprep.subr.mxu0 %v449_v8 }
  0x74   :  { %1091 = vmatpush3.msra.mxu0 %v449_v8 }
  0x75   :  { %1092 = vmatprep.subr.mxu0 %v448_v14 }
  0x76   :  { %1093 = vmatpush3.msra.mxu0 %v448_v14  ;;  %v656_v14 = vld [vmem:[#allocation9 + $0x128] sm:$0xff] }
  0x77   :  { %1094 = vmatprep.subr.mxu0 %v447_v16 }
  0x78   :  { %1095 = vmatpush3.msra.mxu0 %v447_v16  ;;  %v654_v16 = vld [vmem:[#allocation9 + $0x118] sm:$0xff] }
  0x79   :  { %1096 = vmatprep.subr.mxu0 %v446_v18 }
  0x7a   :  { %1097 = vmatpush3.msra.mxu0 %v446_v18  ;;  %v652_v18 = vld [vmem:[#allocation9 + $0x108] sm:$0xff] }
  0x7b   :  { %1098 = vmatprep.subr.mxu0 %v445_v20 }
  0x7c   :  { %1099 = vmatpush3.msra.mxu0 %v445_v20 }
  0x7d   :  { %1100 = vmatprep.subr.mxu0 %v444_v22 }
  0x7e   :  { %1101 = vmatpush3.msra.mxu0 %v444_v22 }
  0x7f   :  { %1102 = vmatprep.subr.mxu0 %v443_v24 }
  0x80   :  { %1103 = vmatpush3.msra.mxu0 %v443_v24 }
  0x81   :  { %1104 = vmatprep.subr.mxu0 %v442_v26 }
  0x82   :  { %1105 = vmatpush3.msra.mxu0 %v442_v26 }
  0x83   :  { %1106 = vmatprep.subr.mxu0 %v441_v27 }
  0x84   :  { %1107 = vmatpush3.msra.mxu0 %v441_v27 }
  0x85   :  { %1108 = vmatprep.subr.mxu0 %v440_v28 }
  0x86   :  { %1109 = vmatpush3.msra.mxu0 %v440_v28 }
  0x87   :  { %1110 = vmatprep.subr.mxu0 %v439_v29 }
  0x88   :  { %1111 = vmatpush3.msra.mxu0 %v439_v29 }
 0x107   :  { %v962_v30 = vpop.f32.mrf.mxu0 }
 0x108   :  { %v1000_v31 = vpop.f32.mrf.mxu1 }
 0x109   :  { %v191_v32 = vpop.f32.mrf.mxu0  ;;  %v282_v37 = vadd.f32 %v1000_v31, %v962_v30 }
 0x10a   :  { %v276_v34 = vpop.f32.mrf.mxu1 }
 0x10b   :  { %v277_v40 = vadd.f32 %v276_v34, %v191_v32  ;;  %v806_v32 = vld [vmem:[%s1349_s5] ss:$0 sm:$0xff]  ;;  %s1255_s5 = smov [#allocation10]  }
 0x10c   :  { %v1003_v35 = vpop.f32.mrf.mxu1 }
 0x10d   :  { %v965_v33 = vpop.f32.mrf.mxu0 }
 0x10e   :  { %v286_v42 = vpop.f32.mrf.mxu1  ;;  %v292_v45 = vadd.f32 %v1003_v35, %v965_v33 }
 0x10f   :  { %v201_v36 = vpop.f32.mrf.mxu0 }
 0x110   :  { %v287_v49 = vadd.f32 %v286_v42, %v201_v36  ;;  %v807_v36 = vld [vmem:[%s1350_s6] ss:$0 sm:$0xff]  ;;  %s791_s6 = sshll.u32 %s1255_s5, 4  ;;  %s792_s6 = int_to_ptr.vmem [resolvable:$true] %s791_s6 }
 0x111   :  { %s1223_s21 = scalar_lea.vmem %s792_s6, 512  ;;  %p1228_p2 = scmp.lt.s32.totalorder %s792_s6, %s792_s6 }
 0x112   :  { %p1224_p1 = scmp.ne.s32.totalorder %s792_s6, %s1223_s21  ;;  %p1229_p3 = scmp.lt.s32.totalorder %s1223_s21, %s1223_s21 }
 0x114   :  { %p1230_p4 = por %p1229_p3, %p1228_p2 }
 0x116   :  { %p1231_p5 = pnand %p1230_p4, %p1224_p1 }
 0x129   :  { %v1038_v38 = vpop.f32.mrf.mxu0 }
 0x12a   :  { %v402_v41 = vadd.f32 %v1038_v38, %v282_v37 }
 0x12b   :  { %v382_v44 = vpop.f32.mrf.mxu0 }
 0x12c   :  { %v413_v46 = vmul.f32 %v804_v39, %v402_v41  ;;  %v401_v47 = vadd.f32 %v382_v44, %v277_v40 }
 0x12d   :  { %v1041_v48 = vpop.f32.mrf.mxu0 }
 0x12e   :  { %v424_v50 = vadd.f32 %v805_v43, %v413_v46  ;;  %v412_v51 = vmul.f32 %v804_v39, %v401_v47  ;;  %v404_v52 = vadd.f32 %v1041_v48, %v292_v45 }
 0x12f   :  { %v392_v53 = vpop.f32.mrf.mxu0 }
 0x130   :  { %v428_v54 = vmax.f32 %v424_v50, 0.0  ;;  %v423_v55 = vadd.f32 %v805_v43, %v412_v51  ;;  %v415_v56 = vmul.f32 %v804_v39, %v404_v52  ;;  %v403_v57 = vadd.f32 %v392_v53, %v287_v49 }
 0x132   :  { %432 = vst [vmem:[#allocation3 + $0x9] sm:$0xff] %v428_v54  ;;  %v427_v58 = vmax.f32 %v423_v55, 0.0  ;;  %v426_v59 = vadd.f32 %v805_v43, %v415_v56  ;;  %v414_v60 = vmul.f32 %v804_v39, %v403_v57 }
 0x134   :  { %431 = vst [vmem:[#allocation3 + $0x1] sm:$0xff] %v427_v58  ;;  %v430_v61 = vmax.f32 %v426_v59, 0.0  ;;  %v425_v62 = vadd.f32 %v805_v43, %v414_v60  ;;  %1074 = vmatprep.mubr.f32.mxu1 %v427_v58 }
 0x135   :  { %1075 = vmatmul.mubr.f32.vlgmr.msra.gmra.mxu1 %v428_v54 }
 0x136   :  { %434 = vst [vmem:[#allocation3 + $0x21] sm:$0xff] %v430_v61  ;;  %v429_v0 = vmax.f32 %v425_v62, 0.0  ;;  %1119 = vmatpush3.msra.mxu1 %v666_v25 }
 0x137   :  { %1120 = vmatprep.subr.mxu1 %v665_v63 }
 0x138   :  { %433 = vst [vmem:[#allocation3 + $0x19] sm:$0xff] %v429_v0  ;;  %1121 = vmatpush3.msra.mxu1 %v665_v63  ;;  %1077 = vmatprep.mubr.f32.mxu1 %v429_v0 }
 0x139   :  { %1122 = vmatprep.subr.mxu1 %v664_v1  ;;  %1078 = vmatmul.mubr.f32.gmra.mxu1 %v430_v61  ;;  %v647_v20 = vld [vmem:[#allocation3 + $0xa] sm:$0xff] }
 0x13a   :  { %1123 = vmatpush3.msra.mxu1 %v664_v1 }
 0x13b   :  { %v435_v4 = vld [vmem:[#allocation3] sm:$0xff]  ;;  %v436_v5 = vld [vmem:[#allocation3 + $0x8] sm:$0xff]  ;;  %1124 = vmatprep.subr.mxu1 %v663_v2 }
 0x13c   :  { %v646_v6 = vld [vmem:[#allocation3 + $0x2] sm:$0xff]  ;;  %1112 = vmatprep.mubr.f32.mxu0 %v435_v4  ;;  %1125 = vmatpush3.msra.mxu1 %v663_v2 }
 0x13d   :  { %1150 = vmatprep.mubr.f32.mxu1 %v646_v6  ;;  %1113 = vmatmul.mubr.f32.vlgmr.msra.gmra.mxu0 %v436_v5  ;;  %v649_v22 = vld [vmem:[#allocation3 + $0x22] sm:$0xff] }
 0x13e   :  { %1126 = vmatprep.subr.mxu1 %v662_v3 }
 0x13f   :  { %v437_v8 = vld [vmem:[#allocation3 + $0x18] sm:$0xff]  ;;  %v438_v9 = vld [vmem:[#allocation3 + $0x20] sm:$0xff]  ;;  %1127 = vmatpush3.msra.mxu1 %v662_v3 }
 0x140   :  { %1115 = vmatprep.mubr.f32.mxu0 %v437_v8  ;;  %1128 = vmatprep.subr.mxu1 %v661_v7  ;;  %v648_v21 = vld [vmem:[#allocation3 + $0x1a] sm:$0xff] }
 0x141   :  { %1116 = vmatmul.mubr.f32.gmra.mxu0 %v438_v9  ;;  %1129 = vmatpush3.msra.mxu1 %v661_v7 }
 0x142   :  { %1130 = vmatprep.subr.mxu1 %v660_v10 }
 0x143   :  { %1131 = vmatpush3.msra.mxu1 %v660_v10 }
 0x144   :  { %1132 = vmatprep.subr.mxu1 %v659_v11 }
 0x145   :  { %1133 = vmatpush3.msra.mxu1 %v659_v11 }
 0x146   :  { %1134 = vmatprep.subr.mxu1 %v658_v12 }
 0x147   :  { %1135 = vmatpush3.msra.mxu1 %v658_v12 }
 0x148   :  { %1136 = vmatprep.subr.mxu1 %v657_v13 }
 0x149   :  { %1137 = vmatpush3.msra.mxu1 %v657_v13 }
 0x14a   :  { %1138 = vmatprep.subr.mxu1 %v656_v14 }
 0x14b   :  { %1139 = vmatpush3.msra.mxu1 %v656_v14 }
 0x14c   :  { %1140 = vmatprep.subr.mxu1 %v655_v15 }
 0x14d   :  { %1141 = vmatpush3.msra.mxu1 %v655_v15 }
 0x14e   :  { %1142 = vmatprep.subr.mxu1 %v654_v16 }
 0x14f   :  { %1143 = vmatpush3.msra.mxu1 %v654_v16 }
 0x150   :  { %1144 = vmatprep.subr.mxu1 %v653_v17 }
 0x151   :  { %1145 = vmatpush3.msra.mxu1 %v653_v17 }
 0x152   :  { %1146 = vmatprep.subr.mxu1 %v652_v18 }
 0x153   :  { %1147 = vmatpush3.msra.mxu1 %v652_v18 }
 0x154   :  { %1148 = vmatprep.subr.mxu1 %v651_v19 }
 0x155   :  { %1149 = vmatpush3.msra.mxu1 %v651_v19 }
 0x156   :  { %1151 = vmatmul.mubr.f32.vlgmr.msra.gmra.mxu1 %v647_v20 }
 0x157   :  { %1153 = vmatprep.mubr.f32.mxu1 %v648_v21 }
 0x15a   :  { %1154 = vmatmul.mubr.f32.gmra.mxu1 %v649_v22 }
 0x1f5   :  { %v1076_v23 = vpop.f32.mrf.mxu1 }
 0x1f7   :  { %v542_v25 = vpop.f32.mrf.mxu1 }
 0x1f9   :  { %v1079_v27 = vpop.f32.mrf.mxu1 }
 0x1fb   :  { %v552_v29 = vpop.f32.mrf.mxu1 }
 0x1fd   :  { %v1114_v24 = vpop.f32.mrf.mxu0 }
 0x1fe   :  { %v633_v30 = vadd.f32 %v1114_v24, %v1076_v23 }
 0x1ff   :  { %v627_v26 = vpop.f32.mrf.mxu0 }
 0x200   :  { %v628_v33 = vadd.f32 %v627_v26, %v542_v25 }
 0x201   :  { %v1117_v28 = vpop.f32.mrf.mxu0 }
 0x202   :  { %v643_v38 = vadd.f32 %v1117_v28, %v1079_v27 }
 0x203   :  { %v637_v35 = vpop.f32.mrf.mxu0 }
 0x204   :  { %v638_v42 = vadd.f32 %v637_v35, %v552_v29 }
 0x216   :  { %v1152_v31 = vpop.f32.mrf.mxu1 }
 0x217   :  { %v753_v34 = vadd.f32 %v1152_v31, %v633_v30 }
 0x218   :  { %v733_v37 = vpop.f32.mrf.mxu1 }
 0x219   :  { %v764_v39 = vmul.f32 %v806_v32, %v753_v34  ;;  %v752_v40 = vadd.f32 %v733_v37, %v628_v33 }
 0x21a   :  { %v1155_v41 = vpop.f32.mrf.mxu1 }
 0x21b   :  { %v775_v43 = vadd.f32 %v807_v36, %v764_v39  ;;  %v763_v44 = vmul.f32 %v806_v32, %v752_v40  ;;  %v755_v45 = vadd.f32 %v1155_v41, %v643_v38 }
 0x21c   :  { %v743_v46 = vpop.f32.mrf.mxu1 }
 0x21d   :  { %v779_v47 = vmax.f32 %v775_v43, 0.0  ;;  %v774_v48 = vadd.f32 %v807_v36, %v763_v44  ;;  %v766_v49 = vmul.f32 %v806_v32, %v755_v45  ;;  %v754_v50 = vadd.f32 %v743_v46, %v638_v42 }
 0x21f   :  { %783 = vst [vmem:[#allocation10 + $0x8] sm:$0xff] %v779_v47  ;;  %v778_v51 = vmax.f32 %v774_v48, 0.0  ;;  %v777_v52 = vadd.f32 %v807_v36, %v766_v49  ;;  %v765_v53 = vmul.f32 %v806_v32, %v754_v50 }
 0x221   :  { %782 = vst [vmem:[#allocation10] sm:$0xff] %v778_v51  ;;  %v781_v54 = vmax.f32 %v777_v52, 0.0  ;;  %v776_v55 = vadd.f32 %v807_v36, %v765_v53 }
 0x223   :  { %785 = vst [vmem:[#allocation10 + $0x18] sm:$0xff] %v781_v54  ;;  %v780_v56 = vmax.f32 %v776_v55, 0.0 }
 0x225   :  { %784 = vst [vmem:[#allocation10 + $0x10] sm:$0xff] %v780_v56 }
 0x226   :  { %1234 = shalt.err (!%p1231_p5)
}
 0x227   :  { %797 = dma.vmem_to_hbm [thread:$0]  %s792_s6, 512, %s1351_s7, [#allocation6], %s1251_s29, %s1251_s29, %s1252_s30  }
 0x228   :  { %1247 = dma.done.wait [#allocation6], 512  }
 0x229   :  { %1248 = vsyncadd [#allocation6], 4294966784 }
 0x22a   :  { %801 = vsyncpa [#allocation5], 1 }
 0x22b   :  { %802 = vsyncpa [#allocation8], 1 }
 0x22c   :  { %803 = vsyncpa [#allocation6], 1 }

</bundles_post_ra>
